<compile_context>
chip_gen: v7x
topology: tpu7x:2x2x1
jax: 0.10.0
libtpu: 0.0.40
codegen_flags: <defaults>
</compile_context>

<pallas_src>
from functools import partial

import numpy as np
import jax
import jax.numpy as jnp
from jax.experimental import pallas as pl
from jax.experimental.pallas import tpu as pltpu


def _shift_left(x, s):
    """out[..., l] = x[..., (l + s) % L].  Callers never select wrapped lanes."""
    lanes = x.shape[-1]
    s = s % lanes
    if s == 0:
        return x
    return jnp.concatenate([x[..., s:], x[..., :s]], axis=-1)


def _compaction_plan(L, w):
    """Static schedule that moves the valid lanes {2W*t + 2j : j < W/2} of an
    L-lane row to lanes {W/2*t + j} (natural pooled-output order).

    Shifts are decomposed LSB-first into power-of-two rotate+select levels.
    Because the left-shift amounts are non-decreasing along the row, the levels
    are provably collision-free; this is also asserted here at trace time.
    Returns a list of (shift, receive_mask[L]) pairs.
    """
    w2 = w // 2
    two_w = 2 * w
    g = L // two_w
    src, dst = [], []
    for t in range(g):
        for j in range(w2):
            src.append(two_w * t + 2 * j)
            dst.append(w2 * t + j)
    src = np.asarray(src, np.int64)
    dst = np.asarray(dst, np.int64)
    shift = src - dst                       # >= 0, non-decreasing along the row
    levels = int(shift.max()).bit_length() if shift.size else 0

    pos = src.copy()
    plan = []
    for k in range(levels):
        step = 1 << k
        moving = ((shift >> k) & 1) == 1
        new_pos = np.where(moving, pos - step, pos)
        assert len(set(new_pos.tolist())) == len(new_pos), "lane-compaction collision"
        mask = np.zeros((L,), np.bool_)
        mask[new_pos[moving]] = True        # lanes that receive from lane + step
        pos = new_pos
        if mask.any():
            plan.append((step, mask))
    assert np.array_equal(pos, dst), "lane-compaction did not reach destinations"

    if not plan:                            # W == 2, g == 1: already in place
        plan = [(1, np.zeros((L,), np.bool_))]
    return plan


def _maxpool2x2_kernel(masks_ref, x_ref, o_ref, *, w, shifts, lout):
    """One grid step over `bg` slab rows of L lanes (g row-pairs per row).

    masks_ref: (levels, L) int32, constant across the grid (resident in VMEM)
    x_ref:     (bg, L)  input rows, each = g x [img row 2r (W) | img row 2r+1 (W)]
    o_ref:     (bg, L//4) pooled rows in natural output order
    """
    v = x_ref[...]
    # (1) H-pool: the vertical partner of lane l (with l mod 2W < W) is W lanes right.
    h = jnp.maximum(v, _shift_left(v, w))
    # (2) W-pool pair max: the horizontal partner is 1 lane to the right.
    p = jnp.maximum(h, _shift_left(h, 1))
    # (3) Lane compaction: constant-shift rotates + selects (NaN/Inf exact, no MXU).
    for k, s in enumerate(shifts):
        m = masks_ref[k:k + 1, :] != 0
        p = jnp.where(m, _shift_left(p, s), p)
    o_ref[...] = p[:, :lout].astype(o_ref.dtype)


def _round_up(a, b):
    return -(-a // b) * b


def _choose_block_rows(rows, row_bytes, target_bytes, sub):
    """Rows per block: full extent for tiny inputs, otherwise a multiple of the
    sublane tile near the byte target, biased toward an even grid-step count
    (v7x splits the single parallel axis across its two TensorCores)."""
    if rows * row_bytes <= target_bytes:
        return rows
    bg = max(sub, (target_bytes // row_bytes) // sub * sub)
    steps = -(-rows // bg)
    if steps > 1 and steps % 2 == 1:
        bg_alt = max(sub, _round_up(-(-rows // (steps + 1)), sub))
        if (-(-rows // bg_alt)) % 2 == 0:
            bg = bg_alt
    return bg


def transition_down(x, *, block_target_bytes=2 * 1024 * 1024, lane_target=512):
    """Equivalent of TransitionDown.forward: F.max_pool2d(x, kernel_size=2).

    x: (N, C, H, W) with H, W even.  Returns (N, C, H//2, W//2), same dtype.
    block_target_bytes: ~input bytes per grid step (2 MiB is safe on v5e/v6e/v7x;
    v6e has headroom for 4-8 MiB if desired).
    """
    n, c, h, w = x.shape
    assert h % 2 == 0 and w % 2 == 0, "H and W must be even for 2x2 max pool"
    h2, w2 = h // 2, w // 2
    r_pairs = n * c * h2                   # independent vertical row-pairs
    two_w = 2 * w

    # Pack g consecutive row-pairs per slab row (g | r_pairs, g*2W <= lane_target
    # when possible) so lanes are dense and the output row is >= 128 lanes wide.
    g = 1
    for d in range(min(r_pairs, max(1, lane_target // two_w)), 0, -1):
        if r_pairs % d == 0:
            g = d
            break
    L = two_w * g
    rows = r_pairs // g
    lout = L // 4

    x2 = x.reshape(rows, L)                # pure view: no extra HBM pass
    plan = _compaction_plan(L, w)
    shifts = tuple(s for s, _ in plan)
    masks = jnp.asarray(np.stack([m for _, m in plan]).astype(np.int32))  # (levels, L)
    levels = masks.shape[0]

    itemsize = jnp.dtype(x.dtype).itemsize
    sub = {4: 8, 2: 16, 1: 32}.get(itemsize, 8)      # sublane tile per dtype
    row_bytes = L * itemsize
    bg = _choose_block_rows(rows, row_bytes, block_target_bytes, sub)
    grid_steps = -(-rows // bg)

    out2 = pl.pallas_call(
        partial(_maxpool2x2_kernel, w=w, shifts=shifts, lout=lout),
        out_shape=jax.ShapeDtypeStruct((rows, lout), x.dtype),
        grid_spec=pltpu.PrefetchScalarGridSpec(
            num_scalar_prefetch=0,
            grid=(grid_steps,),
            in_specs=[
                # Tiny compaction schedule, same block every step -> VMEM resident.
                pl.BlockSpec((levels, L), lambda i: (0, 0)),
                pl.BlockSpec((bg, L), lambda i: (i, 0)),
            ],
            out_specs=pl.BlockSpec((bg, lout), lambda i: (i, 0)),
        ),
        compiler_params=pltpu.CompilerParams(
            dimension_semantics=("parallel",),
            vmem_limit_bytes=32 * 1024 * 1024,
        ),
    )(masks, x2)

    return out2.reshape(n, c, h2, w2)


if __name__ == "__main__":
    # TransitionDown(in_channels) has no parameters; in_channels only fixes C.
    key = jax.random.PRNGKey(0)
    N, C, H, W = 2, 4, 16, 16
    x = jax.random.normal(key, (N, C, H, W), dtype=jnp.float32)

    out = jax.block_until_ready(transition_down(x))

    # Pure-JAX reference: max over non-overlapping 2x2 windows.
    ref = jnp.max(x.reshape(N, C, H // 2, 2, W // 2, 2), axis=(3, 5))
    assert out.shape == (N, C, H // 2, W // 2)
    assert out.dtype == x.dtype
    # Only max/select ops touch data, so the result is bit-exact.
    assert jnp.array_equal(out, ref), float(jnp.max(jnp.abs(out - ref)))

    print("KERNEL_OK")
</pallas_src>

<mosaic_0001>
module attributes {stable_mosaic.version = 11 : i64} {
  func.func @_maxpool2x2_kernel(%arg0: i32, %arg1: memref<9x512xi32, #tpu.memory_space<vmem>>, %arg2: memref<4x512xf32, #tpu.memory_space<vmem>>, %arg3: memref<4x128xf32, #tpu.memory_space<vmem>>) attributes {dimension_semantics = [#tpu.dimension_semantics<parallel>], iteration_bounds = array<i64: 1>, scalar_prefetch = 0 : i64, scratch_operands = 0 : i64, tpu.core_type = #tpu.core_type<tc>, window_params = [{pipeline_mode = #tpu.pipeline_mode<synchronous>, transform_indices = @transform_0, window_bounds = array<i64: 9, 512>}, {transform_indices = @transform_1, window_bounds = array<i64: 4, 512>}, {transform_indices = @transform_2, window_bounds = array<i64: 4, 128>}]} {
    %c0 = arith.constant 0 : index
    %c0_0 = arith.constant 0 : index
    %0 = vector.load %arg2[%c0, %c0_0] : memref<4x512xf32, #tpu.memory_space<vmem>>, vector<4x512xf32>
    %1 = vector.extract_strided_slice %0 {offsets = [0, 16], sizes = [4, 496], strides = [1, 1]} : vector<4x512xf32> to vector<4x496xf32>
    %2 = vector.extract_strided_slice %0 {offsets = [0, 0], sizes = [4, 16], strides = [1, 1]} : vector<4x512xf32> to vector<4x16xf32>
    %3 = tpu.concatenate %1, %2 in 1 : vector<4x496xf32>, vector<4x16xf32> -> vector<4x512xf32>
    %4 = arith.maximumf %0, %3 : vector<4x512xf32>
    %5 = vector.extract_strided_slice %4 {offsets = [0, 1], sizes = [4, 511], strides = [1, 1]} : vector<4x512xf32> to vector<4x511xf32>
    %6 = vector.extract_strided_slice %4 {offsets = [0, 0], sizes = [4, 1], strides = [1, 1]} : vector<4x512xf32> to vector<4x1xf32>
    %7 = tpu.concatenate %5, %6 in 1 : vector<4x511xf32>, vector<4x1xf32> -> vector<4x512xf32>
    %8 = arith.maximumf %4, %7 : vector<4x512xf32>
    %c0_1 = arith.constant 0 : index
    %c0_2 = arith.constant 0 : index
    %9 = vector.load %arg1[%c0_1, %c0_2] : memref<9x512xi32, #tpu.memory_space<vmem>>, vector<1x512xi32>
    %c0_i32 = arith.constant 0 : i32
    %10 = vector.broadcast %c0_i32 : i32 to vector<1x512xi32>
    %11 = arith.cmpi ne, %9, %10 : vector<1x512xi32>
    %12 = vector.extract_strided_slice %8 {offsets = [0, 1], sizes = [4, 511], strides = [1, 1]} : vector<4x512xf32> to vector<4x511xf32>
    %13 = vector.extract_strided_slice %8 {offsets = [0, 0], sizes = [4, 1], strides = [1, 1]} : vector<4x512xf32> to vector<4x1xf32>
    %14 = tpu.concatenate %12, %13 in 1 : vector<4x511xf32>, vector<4x1xf32> -> vector<4x512xf32>
    %15 = vector.shape_cast %11 : vector<1x512xi1> to vector<1x512xi1>
    %16 = vector.broadcast %15 : vector<1x512xi1> to vector<4x512xi1>
    %17 = arith.select %16, %14, %8 : vector<4x512xi1>, vector<4x512xf32>
    %c1 = arith.constant 1 : index
    %c0_3 = arith.constant 0 : index
    %18 = vector.load %arg1[%c1, %c0_3] : memref<9x512xi32, #tpu.memory_space<vmem>>, vector<1x512xi32>
    %c0_i32_4 = arith.constant 0 : i32
    %19 = vector.broadcast %c0_i32_4 : i32 to vector<1x512xi32>
    %20 = arith.cmpi ne, %18, %19 : vector<1x512xi32>
    %21 = vector.extract_strided_slice %17 {offsets = [0, 2], sizes = [4, 510], strides = [1, 1]} : vector<4x512xf32> to vector<4x510xf32>
    %22 = vector.extract_strided_slice %17 {offsets = [0, 0], sizes = [4, 2], strides = [1, 1]} : vector<4x512xf32> to vector<4x2xf32>
    %23 = tpu.concatenate %21, %22 in 1 : vector<4x510xf32>, vector<4x2xf32> -> vector<4x512xf32>
    %24 = vector.shape_cast %20 : vector<1x512xi1> to vector<1x512xi1>
    %25 = vector.broadcast %24 : vector<1x512xi1> to vector<4x512xi1>
    %26 = arith.select %25, %23, %17 : vector<4x512xi1>, vector<4x512xf32>
    %c2 = arith.constant 2 : index
    %c0_5 = arith.constant 0 : index
    %27 = vector.load %arg1[%c2, %c0_5] : memref<9x512xi32, #tpu.memory_space<vmem>>, vector<1x512xi32>
    %c0_i32_6 = arith.constant 0 : i32
    %28 = vector.broadcast %c0_i32_6 : i32 to vector<1x512xi32>
    %29 = arith.cmpi ne, %27, %28 : vector<1x512xi32>
    %30 = vector.extract_strided_slice %26 {offsets = [0, 4], sizes = [4, 508], strides = [1, 1]} : vector<4x512xf32> to vector<4x508xf32>
    %31 = vector.extract_strided_slice %26 {offsets = [0, 0], sizes = [4, 4], strides = [1, 1]} : vector<4x512xf32> to vector<4x4xf32>
    %32 = tpu.concatenate %30, %31 in 1 : vector<4x508xf32>, vector<4x4xf32> -> vector<4x512xf32>
    %33 = vector.shape_cast %29 : vector<1x512xi1> to vector<1x512xi1>
    %34 = vector.broadcast %33 : vector<1x512xi1> to vector<4x512xi1>
    %35 = arith.select %34, %32, %26 : vector<4x512xi1>, vector<4x512xf32>
    %c3 = arith.constant 3 : index
    %c0_7 = arith.constant 0 : index
    %36 = vector.load %arg1[%c3, %c0_7] : memref<9x512xi32, #tpu.memory_space<vmem>>, vector<1x512xi32>
    %c0_i32_8 = arith.constant 0 : i32
    %37 = vector.broadcast %c0_i32_8 : i32 to vector<1x512xi32>
    %38 = arith.cmpi ne, %36, %37 : vector<1x512xi32>
    %39 = vector.extract_strided_slice %35 {offsets = [0, 8], sizes = [4, 504], strides = [1, 1]} : vector<4x512xf32> to vector<4x504xf32>
    %40 = vector.extract_strided_slice %35 {offsets = [0, 0], sizes = [4, 8], strides = [1, 1]} : vector<4x512xf32> to vector<4x8xf32>
    %41 = tpu.concatenate %39, %40 in 1 : vector<4x504xf32>, vector<4x8xf32> -> vector<4x512xf32>
    %42 = vector.shape_cast %38 : vector<1x512xi1> to vector<1x512xi1>
    %43 = vector.broadcast %42 : vector<1x512xi1> to vector<4x512xi1>
    %44 = arith.select %43, %41, %35 : vector<4x512xi1>, vector<4x512xf32>
    %c4 = arith.constant 4 : index
    %c0_9 = arith.constant 0 : index
    %45 = vector.load %arg1[%c4, %c0_9] : memref<9x512xi32, #tpu.memory_space<vmem>>, vector<1x512xi32>
    %c0_i32_10 = arith.constant 0 : i32
    %46 = vector.broadcast %c0_i32_10 : i32 to vector<1x512xi32>
    %47 = arith.cmpi ne, %45, %46 : vector<1x512xi32>
    %48 = vector.extract_strided_slice %44 {offsets = [0, 16], sizes = [4, 496], strides = [1, 1]} : vector<4x512xf32> to vector<4x496xf32>
    %49 = vector.extract_strided_slice %44 {offsets = [0, 0], sizes = [4, 16], strides = [1, 1]} : vector<4x512xf32> to vector<4x16xf32>
    %50 = tpu.concatenate %48, %49 in 1 : vector<4x496xf32>, vector<4x16xf32> -> vector<4x512xf32>
    %51 = vector.shape_cast %47 : vector<1x512xi1> to vector<1x512xi1>
    %52 = vector.broadcast %51 : vector<1x512xi1> to vector<4x512xi1>
    %53 = arith.select %52, %50, %44 : vector<4x512xi1>, vector<4x512xf32>
    %c5 = arith.constant 5 : index
    %c0_11 = arith.constant 0 : index
    %54 = vector.load %arg1[%c5, %c0_11] : memref<9x512xi32, #tpu.memory_space<vmem>>, vector<1x512xi32>
    %c0_i32_12 = arith.constant 0 : i32
    %55 = vector.broadcast %c0_i32_12 : i32 to vector<1x512xi32>
    %56 = arith.cmpi ne, %54, %55 : vector<1x512xi32>
    %57 = vector.extract_strided_slice %53 {offsets = [0, 32], sizes = [4, 480], strides = [1, 1]} : vector<4x512xf32> to vector<4x480xf32>
    %58 = vector.extract_strided_slice %53 {offsets = [0, 0], sizes = [4, 32], strides = [1, 1]} : vector<4x512xf32> to vector<4x32xf32>
    %59 = tpu.concatenate %57, %58 in 1 : vector<4x480xf32>, vector<4x32xf32> -> vector<4x512xf32>
    %60 = vector.shape_cast %56 : vector<1x512xi1> to vector<1x512xi1>
    %61 = vector.broadcast %60 : vector<1x512xi1> to vector<4x512xi1>
    %62 = arith.select %61, %59, %53 : vector<4x512xi1>, vector<4x512xf32>
    %c6 = arith.constant 6 : index
    %c0_13 = arith.constant 0 : index
    %63 = vector.load %arg1[%c6, %c0_13] : memref<9x512xi32, #tpu.memory_space<vmem>>, vector<1x512xi32>
    %c0_i32_14 = arith.constant 0 : i32
    %64 = vector.broadcast %c0_i32_14 : i32 to vector<1x512xi32>
    %65 = arith.cmpi ne, %63, %64 : vector<1x512xi32>
    %66 = vector.extract_strided_slice %62 {offsets = [0, 64], sizes = [4, 448], strides = [1, 1]} : vector<4x512xf32> to vector<4x448xf32>
    %67 = vector.extract_strided_slice %62 {offsets = [0, 0], sizes = [4, 64], strides = [1, 1]} : vector<4x512xf32> to vector<4x64xf32>
    %68 = tpu.concatenate %66, %67 in 1 : vector<4x448xf32>, vector<4x64xf32> -> vector<4x512xf32>
    %69 = vector.shape_cast %65 : vector<1x512xi1> to vector<1x512xi1>
    %70 = vector.broadcast %69 : vector<1x512xi1> to vector<4x512xi1>
    %71 = arith.select %70, %68, %62 : vector<4x512xi1>, vector<4x512xf32>
    %c7 = arith.constant 7 : index
    %c0_15 = arith.constant 0 : index
    %72 = vector.load %arg1[%c7, %c0_15] : memref<9x512xi32, #tpu.memory_space<vmem>>, vector<1x512xi32>
    %c0_i32_16 = arith.constant 0 : i32
    %73 = vector.broadcast %c0_i32_16 : i32 to vector<1x512xi32>
    %74 = arith.cmpi ne, %72, %73 : vector<1x512xi32>
    %75 = vector.extract_strided_slice %71 {offsets = [0, 128], sizes = [4, 384], strides = [1, 1]} : vector<4x512xf32> to vector<4x384xf32>
    %76 = vector.extract_strided_slice %71 {offsets = [0, 0], sizes = [4, 128], strides = [1, 1]} : vector<4x512xf32> to vector<4x128xf32>
    %77 = tpu.concatenate %75, %76 in 1 : vector<4x384xf32>, vector<4x128xf32> -> vector<4x512xf32>
    %78 = vector.shape_cast %74 : vector<1x512xi1> to vector<1x512xi1>
    %79 = vector.broadcast %78 : vector<1x512xi1> to vector<4x512xi1>
    %80 = arith.select %79, %77, %71 : vector<4x512xi1>, vector<4x512xf32>
    %c8 = arith.constant 8 : index
    %c0_17 = arith.constant 0 : index
    %81 = vector.load %arg1[%c8, %c0_17] : memref<9x512xi32, #tpu.memory_space<vmem>>, vector<1x512xi32>
    %c0_i32_18 = arith.constant 0 : i32
    %82 = vector.broadcast %c0_i32_18 : i32 to vector<1x512xi32>
    %83 = arith.cmpi ne, %81, %82 : vector<1x512xi32>
    %84 = vector.extract_strided_slice %80 {offsets = [0, 256], sizes = [4, 256], strides = [1, 1]} : vector<4x512xf32> to vector<4x256xf32>
    %85 = vector.extract_strided_slice %80 {offsets = [0, 0], sizes = [4, 256], strides = [1, 1]} : vector<4x512xf32> to vector<4x256xf32>
    %86 = tpu.concatenate %84, %85 in 1 : vector<4x256xf32>, vector<4x256xf32> -> vector<4x512xf32>
    %87 = vector.shape_cast %83 : vector<1x512xi1> to vector<1x512xi1>
    %88 = vector.broadcast %87 : vector<1x512xi1> to vector<4x512xi1>
    %89 = arith.select %88, %86, %80 : vector<4x512xi1>, vector<4x512xf32>
    %90 = vector.extract_strided_slice %89 {offsets = [0, 0], sizes = [4, 128], strides = [1, 1]} : vector<4x512xf32> to vector<4x128xf32>
    %c0_19 = arith.constant 0 : index
    %c0_20 = arith.constant 0 : index
    %91 = vector.load %arg3[%c0_19, %c0_20] : memref<4x128xf32, #tpu.memory_space<vmem>>, vector<4x128xf32>
    tpu.vector_store %arg3[%c0_19, %c0_20], %90 {strides = array<i32>} : memref<4x128xf32, #tpu.memory_space<vmem>>, vector<4x128xf32>,
    return
  }
  func.func @transform_0(%arg0: i32) -> (i32, i32) {
    %c0_i32 = arith.constant 0 : i32
    %c0_i32_0 = arith.constant 0 : i32
    %c0_i32_1 = arith.constant 0 : i32
    return %c0_i32, %c0_i32_0 : i32, i32
  }
  func.func @transform_1(%arg0: i32) -> (i32, i32) {
    %c0_i32 = arith.constant 0 : i32
    %c0_i32_0 = arith.constant 0 : i32
    return %arg0, %c0_i32 : i32, i32
  }
  func.func @transform_2(%arg0: i32) -> (i32, i32) {
    %c0_i32 = arith.constant 0 : i32
    %c0_i32_0 = arith.constant 0 : i32
    return %arg0, %c0_i32 : i32, i32
  }
}

</mosaic_0001>

<bundles_post_ra>
// kernel: tpu_custom_call.1
= control target key start
LH: loop header
LB: loop body
LE: loop exit
PB: predicated region body
PF: predicated region fallthrough
CT: control target
= control target key end

     0   :  { %7 = vsyncpa [#allocation3], 0  ;;  %s741_s0 = inlined_call_operand.hbm [shape: s32[9,512], index: 0, kind: input, shape index: {}]   ;;  %s742_s1 = inlined_call_operand.hbm [shape: f32[4,512], index: 1, kind: input, shape index: {}]   ;;  %s743_s2 = inlined_call_operand.hbm [shape: f32[4,128], index: 2, kind: output, shape index: {}]  }
   0x1   :  { %8 = vsyncpa [#allocation6], 0 }
   0x2   :  { %9 = vsyncpa [#allocation4], 0  ;;  %s571_s9 = smov [#allocation2]   ;;  %s499_s13 = scalar_lea.hbm %s741_s0, 1024 }
   0x3   :  { %s15_s10 = sshll.u32 %s571_s9, 4  ;;  %p500_p0 = scmp.ne.s32.totalorder %s741_s0, %s499_s13  ;;  %s16_s10 = int_to_ptr.vmem [resolvable:$true] %s15_s10 }
   0x4   :  { %p503_p1 = scmp.lt.u32.totalorder %s499_s13, %s741_s0 }
   0x6   :  { %p505_p2 = pnand %p503_p1, %p500_p0 }
   0x8   :  { %508 = shalt.err (!%p505_p2)
}
   0x9   :  { %s509_s18 = scalar_lea.vmem %s16_s10, 1024  ;;  %p514_p4 = scmp.lt.s32.totalorder %s16_s10, %s16_s10 }
   0xa   :  { %p510_p3 = scmp.ne.s32.totalorder %s16_s10, %s509_s18  ;;  %p515_p5 = scmp.lt.s32.totalorder %s509_s18, %s509_s18 }
   0xc   :  { %p516_p6 = por %p515_p5, %p514_p4 }
   0xe   :  { %p517_p7 = pnand %p516_p6, %p510_p3 }
  0x10   :  { %520 = shalt.err (!%p517_p7)
}
  0x11   :  { %s572_s19 = smov 512   ;;  %s573_s20 = smov 32  }
  0x12   :  { %21 = dma.hbm_to_vmem [thread:$0]  %s741_s0, 1024, %s16_s10, [#allocation3], %s572_s19, %s572_s19, %s573_s20  }
  0x13   :  { %s574_s23 = smov [#allocation5]   ;;  %s521_s27 = scalar_lea.hbm %s742_s1, 256 }
  0x14   :  { %s28_s24 = sshll.u32 %s574_s23, 4  ;;  %p522_p8 = scmp.ne.s32.totalorder %s742_s1, %s521_s27  ;;  %s29_s24 = int_to_ptr.vmem [resolvable:$true] %s28_s24 }
  0x15   :  { %p525_p9 = scmp.lt.u32.totalorder %s521_s27, %s742_s1 }
  0x17   :  { %p527_p10 = pnand %p525_p9, %p522_p8 }
  0x19   :  { %530 = shalt.err (!%p527_p10)
}
  0x1a   :  { %s531_s4 = scalar_lea.vmem %s29_s24, 256  ;;  %p536_p12 = scmp.lt.s32.totalorder %s29_s24, %s29_s24 }
  0x1b   :  { %p532_p11 = scmp.ne.s32.totalorder %s29_s24, %s531_s4  ;;  %p537_p13 = scmp.lt.s32.totalorder %s531_s4, %s531_s4 }
  0x1d   :  { %p538_p0 = por %p537_p13, %p536_p12 }
  0x1f   :  { %p539_p1 = pnand %p538_p0, %p532_p11 }
  0x21   :  { %542 = shalt.err (!%p539_p1)
}
  0x22   :  { %31 = dma.hbm_to_vmem [thread:$0]  %s742_s1, 256, %s29_s24, [#allocation6]  }
  0x23   :  { %565 = dma.done.wait [#allocation3], 1024  }
  0x24   :  { %566 = vsyncadd [#allocation3], 4294966272 }
  0x25   :  { %567 = dma.done.wait [#allocation6], 256  }
  0x26   :  { %568 = vsyncadd [#allocation6], 4294967040  ;;  %v39_v0 = vld [vmem:[#allocation5 + $0x8] sm:$0xff]  ;;  %v38_v1 = vld [vmem:[#allocation5] sm:$0xff]  ;;  %s575_s6 = smov 112   ;;  %vm52_vm0 = vcmask 916480   ;;  %v116_v32 = vlaneseq }
  0x27   :  { %48 = vrot.lane.b32.xlu1 %v39_v0, %s575_s6  ;;  %44 = vrot.lane.b32.xlu0 %v38_v1, %s575_s6  ;;  %v43_v2 = vcombine.high %v39_v0, %v39_v0  ;;  %v42_v3 = vcombine.high %v38_v1, %v38_v1  ;;  %s576_s1 = smov 127   ;;  %vm78_vm1 = vcmask 1039360   ;;  %v92_v33 = vld [vmem:[#allocation2] ss:$8 sm:$0xf]  ;;  %v577_v36 = vmov 0  }
  0x28   :  { %v117_v34 = vshrl.u32 %v116_v32, 7  ;;  %vm93_vm2 = vcmp.ne.s32.totalorder %v92_v33, 0  ;;  %s578_s7 = smov 126   ;;  %v143_v57 = vld [vmem:[#allocation2 + $0x1] ss:$8 sm:$0xf] }
  0x29   :  { %v115_v37 = vsel %vm93_vm2, 1, %v577_v36  ;;  %vm144_vm7 = vcmp.ne.s32.totalorder %v143_v57, 0  ;;  %vm157_vm8 = vcmask 1031168   ;;  %s579_s8 = smov 124   ;;  %vm207_vm14 = vcmask 1014784   ;;  %s580_s9 = smov 120  }
  0x2a   :  { %v635_v35 = vsub.s32 0, %v117_v34  ;;  %v638_v38 = vsub.s32 1, %v117_v34  ;;  %v641_v40 = vsub.s32 2, %v117_v34  ;;  %v644_v42 = vsub.s32 3, %v117_v34  ;;  %s581_s10 = smov 96   ;;  %s582_s11 = smov 64  }
  0x2b   :  { %50 = vrot.lane.b32.xlu1 %v43_v2, %s575_s6  ;;  %46 = vrot.lane.b32.xlu0 %v42_v3, %s575_s6  ;;  %v167_v58 = vsel %vm144_vm7, 1, %v577_v36  ;;  %s583_s12 = smov [#allocation7]  }
  0x2c   :  { %v119_v39 = vrot.slane %v115_v37, %v635_v35  ;;  %v123_v41 = vrot.slane %v115_v37, %v638_v38  ;;  %v127_v44 = vrot.slane %v115_v37, %v641_v40  ;;  %v131_v47 = vrot.slane %v115_v37, %v644_v42  ;;  %s474_s13 = sshll.u32 %s583_s12, 4  ;;  %s475_s13 = int_to_ptr.vmem [resolvable:$true] %s474_s13 }
  0x2d   :  { %v171_v59 = vrot.slane %v167_v58, %v635_v35  ;;  %v175_v60 = vrot.slane %v167_v58, %v638_v38  ;;  %v179_v62 = vrot.slane %v167_v58, %v641_v40  ;;  %s543_s14 = scalar_lea.vmem %s475_s13, 64  ;;  %p548_p3 = scmp.lt.s32.totalorder %s475_s13, %s475_s13 }
  0x2e   :  { %vm132_vm3 = vcmp.eq.s32.totalorder %v119_v39, 1  ;;  %vm133_vm4 = vcmp.eq.s32.totalorder %v123_v41, 1  ;;  %vm134_vm5 = vcmp.eq.s32.totalorder %v127_v44, 1  ;;  %vm135_vm6 = vcmp.eq.s32.totalorder %v131_v47, 1  ;;  %p544_p2 = scmp.ne.s32.totalorder %s475_s13, %s543_s14  ;;  %p549_p4 = scmp.lt.s32.totalorder %s543_s14, %s543_s14 }
  0x2f   :  { %vm184_vm9 = vcmp.eq.s32.totalorder %v171_v59, 1  ;;  %vm185_vm10 = vcmp.eq.s32.totalorder %v175_v60, 1  ;;  %vm186_vm11 = vcmp.eq.s32.totalorder %v179_v62, 1 }
  0x30   :  { %p550_p5 = por %p549_p4, %p548_p3 }
  0x32   :  { %p551_p6 = pnand %p550_p5, %p544_p2 }
  0x99   :  { %v49_v4 = vpop.permute.xlu1 %48  ;;  %v45_v5 = vpop.permute.xlu0 %44 }
  0x9d   :  { %v51_v6 = vpop.permute.xlu1 %50  ;;  %v47_v7 = vpop.permute.xlu0 %46 }
  0x9e   :  { %v55_v8 = vsel %vm52_vm0, %v49_v4, %v51_v6  ;;  %v58_v9 = vsel %vm52_vm0, %v51_v6, %v45_v5  ;;  %v53_v10 = vsel %vm52_vm0, %v45_v5, %v47_v7  ;;  %v54_v11 = vsel %vm52_vm0, %v47_v7, %v49_v4 }
  0x9f   :  { %v61_v12 = vcombine.low %v55_v8, %v58_v9  ;;  %v60_v13 = vcombine.low %v53_v10, %v54_v11  ;;  %v193_v11 = vld [vmem:[#allocation2 + $0x2] ss:$8 sm:$0xf] }
  0xa0   :  { %vm194_vm13 = vcmp.ne.s32.totalorder %v193_v11, 0 }
  0xa1   :  { %v64_v14 = vmax.f32 %v38_v1, %v60_v13  ;;  %v65_v16 = vmax.f32 %v39_v0, %v61_v12  ;;  %v183_v1 = vrot.slane %v167_v58, %v644_v42  ;;  %v217_v12 = vsel %vm194_vm13, 1, %v577_v36 }
  0xa2   :  { %v221_v13 = vrot.slane %v217_v12, %v635_v35 }
  0xa3   :  { %70 = vrot.lane.b32.xlu0 %v64_v14, %s576_s1  ;;  %v68_v15 = vcombine.high %v64_v14, %v64_v14  ;;  %v69_v17 = vcombine.high %v65_v16, %v65_v16  ;;  %vm187_vm12 = vcmp.eq.s32.totalorder %v183_v1, 1 }
  0xa4   :  { %vm234_vm15 = vcmp.eq.s32.totalorder %v221_v13, 1 }
  0xa5   :  { %72 = vrot.lane.b32.xlu1 %v68_v15, %s576_s1 }
  0xa7   :  { %74 = vrot.lane.b32.xlu0 %v65_v16, %s576_s1 }
  0xa9   :  { %76 = vrot.lane.b32.xlu1 %v69_v17, %s576_s1 }
 0x115   :  { %v71_v18 = vpop.permute.xlu0 %70 }
 0x117   :  { %v73_v19 = vpop.permute.xlu1 %72 }
 0x118   :  { %v79_v21 = vsel %vm78_vm1, %v71_v18, %v73_v19 }
 0x119   :  { %v75_v20 = vpop.permute.xlu0 %74 }
 0x11a   :  { %v80_v22 = vsel %vm78_vm1, %v73_v19, %v75_v20  ;;  %v233_v19 = vrot.slane %v217_v12, %v644_v42 }
 0x11b   :  { %v86_v23 = vcombine.low %v79_v21, %v80_v22  ;;  %v77_v24 = vpop.permute.xlu1 %76 }
 0x11c   :  { %v81_v25 = vsel %vm78_vm1, %v75_v20, %v77_v24  ;;  %v84_v26 = vsel %vm78_vm1, %v77_v24, %v71_v18 }
 0x11d   :  { %v87_v27 = vcombine.low %v81_v25, %v84_v26  ;;  %v90_v28 = vmax.f32 %v64_v14, %v86_v23  ;;  %v225_v14 = vrot.slane %v217_v12, %v638_v38 }
 0x11f   :  { %98 = vrot.lane.b32.xlu0 %v90_v28, %s576_s1  ;;  %v96_v29 = vcombine.high %v90_v28, %v90_v28  ;;  %v91_v30 = vmax.f32 %v65_v16, %v87_v27  ;;  %v229_v16 = vrot.slane %v217_v12, %v641_v40 }
 0x121   :  { %100 = vrot.lane.b32.xlu1 %v96_v29, %s576_s1  ;;  %v97_v31 = vcombine.high %v91_v30, %v91_v30  ;;  %vm236_vm2 = vcmp.eq.s32.totalorder %v229_v16, 1 }
 0x123   :  { %102 = vrot.lane.b32.xlu0 %v91_v30, %s576_s1 }
 0x125   :  { %104 = vrot.lane.b32.xlu1 %v97_v31, %s576_s1 }
 0x191   :  { %v99_v43 = vpop.permute.xlu0 %98 }
 0x193   :  { %v101_v45 = vpop.permute.xlu1 %100 }
 0x194   :  { %v106_v46 = vsel %vm78_vm1, %v99_v43, %v101_v45 }
 0x195   :  { %v103_v48 = vpop.permute.xlu0 %102  ;;  %v138_v49 = vsel %vm132_vm3, %v106_v46, %v90_v28  ;;  %vm237_vm3 = vcmp.eq.s32.totalorder %v233_v19, 1 }
 0x196   :  { %v107_v50 = vsel %vm78_vm1, %v101_v45, %v103_v48  ;;  %149 = vrot.lane.b32.xlu0 %v138_v49, %s578_s7 }
 0x197   :  { %v105_v51 = vpop.permute.xlu1 %104  ;;  %v139_v52 = vsel %vm133_vm4, %v107_v50, %v96_v29  ;;  %v243_v29 = vld [vmem:[#allocation2 + $0x3] ss:$8 sm:$0xf] }
 0x198   :  { %v108_v53 = vsel %vm78_vm1, %v103_v48, %v105_v51  ;;  %v114_v54 = vsel %vm78_vm1, %v105_v51, %v99_v43  ;;  %151 = vrot.lane.b32.xlu1 %v139_v52, %s578_s7  ;;  %vm235_vm1 = vcmp.eq.s32.totalorder %v225_v14, 1  ;;  %vm244_vm4 = vcmp.ne.s32.totalorder %v243_v29, 0 }
 0x199   :  { %v140_v55 = vsel %vm134_vm5, %v108_v53, %v91_v30  ;;  %v141_v56 = vsel %vm135_vm6, %v114_v54, %v97_v31  ;;  %v267_v30 = vsel %vm244_vm4, 1, %v577_v36  ;;  %vm257_vm5 = vcmask 982016  }
 0x19a   :  { %153 = vrot.lane.b32.xlu0 %v140_v55, %s578_s7  ;;  %v271_v31 = vrot.slane %v267_v30, %v635_v35  ;;  %v275_v32 = vrot.slane %v267_v30, %v638_v38  ;;  %v279_v34 = vrot.slane %v267_v30, %v641_v40  ;;  %v283_v41 = vrot.slane %v267_v30, %v644_v42 }
 0x19c   :  { %155 = vrot.lane.b32.xlu1 %v141_v56, %s578_s7  ;;  %vm284_vm6 = vcmp.eq.s32.totalorder %v271_v31, 1  ;;  %vm285_vm7 = vcmp.eq.s32.totalorder %v275_v32, 1 }
 0x208   :  { %v150_v61 = vpop.permute.xlu0 %149 }
 0x20a   :  { %v152_v63 = vpop.permute.xlu1 %151 }
 0x20b   :  { %v158_v0 = vsel %vm157_vm8, %v150_v61, %v152_v63 }
 0x20c   :  { %v154_v2 = vpop.permute.xlu0 %153  ;;  %v188_v3 = vsel %vm184_vm9, %v158_v0, %v138_v49  ;;  %vm287_vm9 = vcmp.eq.s32.totalorder %v283_v41, 1 }
 0x20d   :  { %v159_v4 = vsel %vm157_vm8, %v152_v63, %v154_v2  ;;  %199 = vrot.lane.b32.xlu0 %v188_v3, %s579_s8 }
 0x20e   :  { %v156_v5 = vpop.permute.xlu1 %155  ;;  %v189_v6 = vsel %vm185_vm10, %v159_v4, %v139_v52  ;;  %v293_v52 = vld [vmem:[#allocation2 + $0x4] ss:$8 sm:$0xf] }
 0x20f   :  { %v160_v7 = vsel %vm157_vm8, %v154_v2, %v156_v5  ;;  %v166_v8 = vsel %vm157_vm8, %v156_v5, %v150_v61  ;;  %201 = vrot.lane.b32.xlu1 %v189_v6, %s579_s8  ;;  %vm286_vm8 = vcmp.eq.s32.totalorder %v279_v34, 1  ;;  %vm294_vm10 = vcmp.ne.s32.totalorder %v293_v52, 0 }
 0x210   :  { %v190_v9 = vsel %vm186_vm11, %v160_v7, %v140_v55  ;;  %v191_v10 = vsel %vm187_vm12, %v166_v8, %v141_v56  ;;  %v316_v53 = vsel %vm294_vm10, 1, %v577_v36 }
 0x211   :  { %203 = vrot.lane.b32.xlu0 %v190_v9, %s579_s8  ;;  %v320_v54 = vrot.slane %v316_v53, %v635_v35  ;;  %v324_v55 = vrot.slane %v316_v53, %v638_v38  ;;  %v328_v57 = vrot.slane %v316_v53, %v641_v40  ;;  %v332_v60 = vrot.slane %v316_v53, %v644_v42 }
 0x213   :  { %205 = vrot.lane.b32.xlu1 %v191_v10, %s579_s8  ;;  %vm333_vm11 = vcmp.eq.s32.totalorder %v320_v54, 1  ;;  %vm334_vm12 = vcmp.eq.s32.totalorder %v324_v55, 1  ;;  %vm335_vm13 = vcmp.eq.s32.totalorder %v328_v57, 1 }
 0x27f   :  { %v200_v15 = vpop.permute.xlu0 %199 }
 0x281   :  { %v202_v17 = vpop.permute.xlu1 %201 }
 0x282   :  { %v208_v18 = vsel %vm207_vm14, %v200_v15, %v202_v17 }
 0x283   :  { %v204_v20 = vpop.permute.xlu0 %203  ;;  %v238_v21 = vsel %vm234_vm15, %v208_v18, %v188_v3 }
 0x284   :  { %v209_v22 = vsel %vm207_vm14, %v202_v17, %v204_v20  ;;  %249 = vrot.lane.b32.xlu0 %v238_v21, %s580_s9 }
 0x285   :  { %v206_v23 = vpop.permute.xlu1 %205  ;;  %v239_v24 = vsel %vm235_vm1, %v209_v22, %v189_v6  ;;  %v342_v6 = vld [vmem:[#allocation2 + $0x5] ss:$8 sm:$0xf]  ;;  %vm356_vm1 = vcmask 785408  }
 0x286   :  { %v210_v25 = vsel %vm207_vm14, %v204_v20, %v206_v23  ;;  %v216_v26 = vsel %vm207_vm14, %v206_v23, %v200_v15  ;;  %251 = vrot.lane.b32.xlu1 %v239_v24, %s580_s9  ;;  %vm336_vm14 = vcmp.eq.s32.totalorder %v332_v60, 1  ;;  %vm343_vm15 = vcmp.ne.s32.totalorder %v342_v6, 0 }
 0x287   :  { %v240_v27 = vsel %vm236_vm2, %v210_v25, %v190_v9  ;;  %v241_v28 = vsel %vm237_vm3, %v216_v26, %v191_v10  ;;  %v366_v7 = vsel %vm343_vm15, 1, %v577_v36  ;;  %v442_v25 = vld [vmem:[#allocation2 + $0x7] ss:$8 sm:$0xf] }
 0x288   :  { %253 = vrot.lane.b32.xlu0 %v240_v27, %s580_s9  ;;  %v370_v8 = vrot.slane %v366_v7, %v635_v35  ;;  %v374_v9 = vrot.slane %v366_v7, %v638_v38  ;;  %v378_v11 = vrot.slane %v366_v7, %v641_v40  ;;  %v382_v14 = vrot.slane %v366_v7, %v644_v42  ;;  %v458_v26 = vld [vmem:[#allocation2 + $0x20] ss:$8 sm:$0xf] }
 0x28a   :  { %255 = vrot.lane.b32.xlu1 %v241_v28, %s580_s9  ;;  %vm383_vm2 = vcmp.eq.s32.totalorder %v370_v8, 1  ;;  %vm385_vm3 = vcmp.eq.s32.totalorder %v378_v11, 1  ;;  %vm386_vm4 = vcmp.eq.s32.totalorder %v382_v14, 1 }
 0x2f6   :  { %v250_v33 = vpop.permute.xlu0 %249 }
 0x2f8   :  { %v252_v37 = vpop.permute.xlu1 %251 }
 0x2f9   :  { %v258_v39 = vsel %vm257_vm5, %v250_v33, %v252_v37 }
 0x2fa   :  { %v254_v43 = vpop.permute.xlu0 %253  ;;  %v288_v44 = vsel %vm284_vm6, %v258_v39, %v238_v21  ;;  %vm443_vm6 = vcmp.ne.s32.totalorder %v442_v25, 0 }
 0x2fb   :  { %v259_v45 = vsel %vm257_vm5, %v252_v37, %v254_v43  ;;  %299 = vrot.lane.b32.xlu0 %v288_v44, %s575_s6  ;;  %v444_v29 = vsel %vm443_vm6, 1, %v577_v36 }
 0x2fc   :  { %v256_v46 = vpop.permute.xlu1 %255  ;;  %v289_v47 = vsel %vm285_vm7, %v259_v45, %v239_v24  ;;  %v392_v24 = vld [vmem:[#allocation2 + $0x6] ss:$8 sm:$0xf]  ;;  %vm459_vm7 = vcmp.ne.s32.totalorder %v458_v26, 0  ;;  %v448_v39 = vrot.slane %v444_v29, %v635_v35  ;;  %v452_v41 = vrot.slane %v444_v29, %v641_v40 }
 0x2fd   :  { %v260_v48 = vsel %vm257_vm5, %v254_v43, %v256_v46  ;;  %v266_v49 = vsel %vm257_vm5, %v256_v46, %v250_v33  ;;  %301 = vrot.lane.b32.xlu1 %v289_v47, %s575_s6  ;;  %vm393_vm5 = vcmp.ne.s32.totalorder %v392_v24, 0  ;;  %v460_v32 = vsel %vm459_vm7, 1, %v577_v36 }
 0x2fe   :  { %v290_v50 = vsel %vm286_vm8, %v260_v48, %v240_v27  ;;  %v291_v51 = vsel %vm287_vm9, %v266_v49, %v241_v28  ;;  %v416_v27 = vsel %vm393_vm5, 1, %v577_v36  ;;  %vm406_vm8 = vcmask 523264  }
 0x2ff   :  { %303 = vrot.lane.b32.xlu0 %v290_v50, %s575_s6  ;;  %v424_v28 = vrot.slane %v416_v27, %v638_v38  ;;  %v420_v31 = vrot.slane %v416_v27, %v635_v35  ;;  %v428_v33 = vrot.slane %v416_v27, %v641_v40  ;;  %v432_v34 = vrot.slane %v416_v27, %v644_v42 }
 0x300   :  { %v464_v38 = vrot.slane %v460_v32, %v635_v35 }
 0x301   :  { %305 = vrot.lane.b32.xlu1 %v291_v51, %s575_s6  ;;  %vm706_vm9 = vcmp.eq.s32.totalorder %v424_v28, 1  ;;  %vm711_vm10 = vcmp.eq.s32.totalorder %v420_v31, 1 }
 0x302   :  { %vm465_vm15 = vcmp.eq.s32.totalorder %v464_v38, 1 }
 0x36d   :  { %v300_v56 = vpop.permute.xlu0 %299 }
 0x36f   :  { %v302_v58 = vpop.permute.xlu1 %301 }
 0x370   :  { %v307_v59 = vsel %vm52_vm0, %v300_v56, %v302_v58 }
 0x371   :  { %v304_v61 = vpop.permute.xlu0 %303  ;;  %v337_v62 = vsel %vm333_vm11, %v307_v59, %v288_v44  ;;  %vm717_vm11 = vcmp.eq.s32.totalorder %v428_v33, 1 }
 0x372   :  { %v308_v63 = vsel %vm52_vm0, %v302_v58, %v304_v61  ;;  %348 = vrot.lane.b32.xlu0 %v337_v62, %s581_s10 }
 0x373   :  { %v306_v0 = vpop.permute.xlu1 %305  ;;  %v338_v1 = vsel %vm334_vm12, %v308_v63, %v289_v47  ;;  %vm436_vm12 = vcmp.eq.s32.totalorder %v432_v34, 1 }
 0x374   :  { %v309_v2 = vsel %vm52_vm0, %v304_v61, %v306_v0  ;;  %v315_v3 = vsel %vm52_vm0, %v306_v0, %v300_v56  ;;  %350 = vrot.lane.b32.xlu1 %v338_v1, %s581_s10  ;;  %vm384_vm0 = vcmp.eq.s32.totalorder %v374_v9, 1 }
 0x375   :  { %v339_v4 = vsel %vm335_vm13, %v309_v2, %v290_v50  ;;  %v340_v5 = vsel %vm336_vm14, %v315_v3, %v291_v51  ;;  %vm453_vm13 = vcmp.eq.s32.totalorder %v448_v39, 1  ;;  %vm454_vm14 = vcmp.eq.s32.totalorder %v452_v41, 1 }
 0x376   :  { %352 = vrot.lane.b32.xlu0 %v339_v4, %s581_s10 }
 0x378   :  { %354 = vrot.lane.b32.xlu1 %v340_v5, %s581_s10 }
 0x3e4   :  { %v349_v10 = vpop.permute.xlu0 %348 }
 0x3e6   :  { %v351_v12 = vpop.permute.xlu1 %350 }
 0x3e7   :  { %v357_v13 = vsel %vm356_vm1, %v349_v10, %v351_v12 }
 0x3e8   :  { %v353_v15 = vpop.permute.xlu0 %352  ;;  %v387_v16 = vsel %vm383_vm2, %v357_v13, %v337_v62 }
 0x3e9   :  { %v358_v17 = vsel %vm356_vm1, %v351_v12, %v353_v15  ;;  %398 = vrot.lane.b32.xlu0 %v387_v16, %s582_s11 }
 0x3ea   :  { %v355_v18 = vpop.permute.xlu1 %354  ;;  %v388_v19 = vsel %vm384_vm0, %v358_v17, %v338_v1 }
 0x3eb   :  { %v359_v20 = vsel %vm356_vm1, %v353_v15, %v355_v18  ;;  %v365_v21 = vsel %vm356_vm1, %v355_v18, %v349_v10  ;;  %400 = vrot.lane.b32.xlu1 %v388_v19, %s582_s11 }
 0x3ec   :  { %v389_v22 = vsel %vm385_vm3, %v359_v20, %v339_v4  ;;  %v390_v23 = vsel %vm386_vm4, %v365_v21, %v340_v5 }
 0x3ed   :  { %402 = vrot.lane.b32.xlu0 %v389_v22, %s582_s11 }
 0x3ef   :  { %404 = vrot.lane.b32.xlu1 %v390_v23, %s582_s11 }
 0x45b   :  { %v399_v30 = vpop.permute.xlu0 %398 }
 0x45d   :  { %v401_v37 = vpop.permute.xlu1 %400 }
 0x45e   :  { %v407_v45 = vsel %vm406_vm8, %v399_v30, %v401_v37 }
 0x45f   :  { %v403_v36 = vpop.permute.xlu0 %402  ;;  %v437_v49 = vsel %vm711_vm10, %v407_v45, %v387_v16 }
 0x460   :  { %v408_v42 = vsel %vm406_vm8, %v401_v37, %v403_v36 }
 0x461   :  { %v438_v40 = vsel %vm706_vm9, %v408_v42, %v388_v19  ;;  %v405_v47 = vpop.permute.xlu1 %404 }
 0x462   :  { %v409_v35 = vsel %vm406_vm8, %v403_v36, %v405_v47  ;;  %v415_v48 = vsel %vm406_vm8, %v405_v47, %v399_v30  ;;  %v455_v52 = vsel %vm453_vm13, %v438_v40, %v437_v49 }
 0x463   :  { %v439_v50 = vsel %vm717_vm11, %v409_v35, %v389_v22  ;;  %v440_v51 = vsel %vm436_vm12, %v415_v48, %v390_v23 }
 0x464   :  { %v456_v53 = vsel %vm454_vm14, %v440_v51, %v439_v50 }
 0x465   :  { %v466_v54 = vsel %vm465_vm15, %v456_v53, %v455_v52 }
 0x466   :  { %467 = vst [vmem:[#allocation7] sm:$0xf] %v466_v54 }
 0x467   :  { %554 = shalt.err (!%p551_p6)
}
 0x468   :  { %s555_s17 = scalar_lea.hbm %s743_s2, 64 }
 0x469   :  { %p556_p7 = scmp.ne.s32.totalorder %s743_s2, %s555_s17  ;;  %p559_p8 = scmp.lt.u32.totalorder %s555_s17, %s743_s2 }
 0x46b   :  { %p561_p9 = pnand %p559_p8, %p556_p7 }
 0x46d   :  { %564 = shalt.err (!%p561_p9)
}
 0x46e   :  { %477 = dma.vmem_to_hbm [thread:$0]  %s475_s13, 64, %s743_s2, [#allocation4]  }
 0x46f   :  { %569 = dma.done.wait [#allocation4], 64  }
 0x470   :  { %570 = vsyncadd [#allocation4], 4294967232 }
 0x471   :  { %481 = vsyncpa [#allocation3], 1 }
 0x472   :  { %482 = vsyncpa [#allocation6], 1 }
 0x473   :  { %483 = vsyncpa [#allocation4], 1 }

</bundles_post_ra>
